<compile_context>
chip_gen: v7x
topology: tpu7x:2x2x1
jax: 0.10.0
libtpu: 0.0.40
codegen_flags: <defaults>
</compile_context>

<pallas_src>
import functools

import jax
import jax.numpy as jnp
from jax.experimental import pallas as pl
from jax.experimental.pallas import tpu as pltpu

SMOOTHING = 0.1
IGNORE_INDEX = 1

_MAX_ROW_TILE = 2048


def _vmem_capacity_bytes():
    try:
        return int(pltpu.get_tpu_info().vmem_capacity_bytes)
    except Exception:
        return 64 * 1024 * 1024  # conservative (v7x-sized) fallback


def _label_smoothing_kernel(pred_ref, tgt_ref, out_ref, *, smoothing, ignore_index):
    pred = pred_ref[...].astype(jnp.float32)                 # (tm, C) f32 math
    tgt = tgt_ref[...]                                        # (tm, 1) int32
    tm, C = pred.shape

    uniform = jnp.float32(smoothing / (C - 1))
    confidence = jnp.float32(1.0 - smoothing)

    # log-softmax pieces (single pass, no logp / true_dist materialization).
    m = jnp.max(pred, axis=1, keepdims=True)                  # (tm, 1)
    shifted = pred - m                                         # (tm, C)
    lse = jnp.log(jnp.sum(jnp.exp(shifted), axis=1, keepdims=True))  # (tm, 1)

    valid = tgt != ignore_index                                # (tm, 1) bool
    tgt_safe = jnp.where(valid, tgt, 0)                        # masked_fill(~mask, 0)

    col = jax.lax.broadcasted_iota(jnp.int32, (tm, C), 1)
    w = jnp.where(col == tgt_safe, confidence, uniform)        # (tm, C)

    # sum_c w == 1  =>  -sum_c true_dist*logp == lse - sum_c w*shifted (valid rows)
    weighted = jnp.sum(w * shifted, axis=1, keepdims=True)     # (tm, 1)
    per_row = jnp.where(valid, lse - weighted, jnp.float32(0.0))

    block_sum = jnp.sum(per_row)                               # scalar, f32
    # Lane-dense write of the partial sum; host reads [:, 0, 0].
    out_ref[...] = jnp.zeros_like(out_ref) + block_sum


def label_smoothing_loss(pred, target, *, smoothing=SMOOTHING,
                         ignore_index=IGNORE_INDEX, row_tile=None):
    """pred: (N, C) float32 or bfloat16; target: (N,) int. Returns f32 scalar."""
    N, C = pred.shape
    assert C > 1, "smoothing/(C-1) requires C > 1"
    itemsize = jnp.dtype(pred.dtype).itemsize
    granule = 16 if itemsize == 2 else 8          # bf16 native sublane tiling is 16

    vmem_cap = _vmem_capacity_bytes()

    if row_tile is None:
        # Per-row VMEM cost: 2x double-buffered pred blocks, ~4 f32 (tm,C)
        # temporaries, plus lane-padded (tm,1) target buffers / column temps.
        per_row_bytes = C * (2 * itemsize + 16) + 6 * 1024
        budget = (55 * vmem_cap) // 100
        rt = budget // per_row_bytes
        rt = max(granule, min(_MAX_ROW_TILE, (rt // granule) * granule))
        n_gran = ((N + granule - 1) // granule) * granule
        row_tile = int(min(rt, n_gran))
    assert row_tile >= granule and row_tile % granule == 0

    # Pad rows to a multiple of the tile; padded rows have target=ignore_index
    # so they contribute 0, while the mean denominator stays the original N.
    n_pad = ((N + row_tile - 1) // row_tile) * row_tile
    num_blocks = n_pad // row_tile
    tgt2d = target.astype(jnp.int32).reshape(N, 1)
    if n_pad != N:
        pred = jnp.pad(pred, ((0, n_pad - N), (0, 0)))
        tgt2d = jnp.pad(tgt2d, ((0, n_pad - N), (0, 0)),
                        constant_values=ignore_index)

    # VMEM accounting with lane padding made explicit:
    #   pred blocks (double-buffered), target blocks pad to (row_tile,128) words,
    #   ~4 f32 (tm,C) temporaries, ~8 lane-padded (tm,1) column intermediates,
    #   tiny (1,8,128) output blocks.
    pred_block_bytes = 2 * row_tile * C * itemsize
    tgt_block_bytes = 2 * row_tile * 128 * 4
    f32_temp_bytes = 4 * row_tile * C * 4
    col_temp_bytes = 8 * row_tile * 128 * 4
    out_block_bytes = 2 * 8 * 128 * 4
    est = pred_block_bytes + tgt_block_bytes + f32_temp_bytes \
        + col_temp_bytes + out_block_bytes
    vmem_limit = int(min(vmem_cap - (4 << 20),
                         max(32 << 20, est + (4 << 20))))

    kernel = functools.partial(
        _label_smoothing_kernel,
        smoothing=float(smoothing), ignore_index=int(ignore_index))

    partials = pl.pallas_call(
        kernel,
        out_shape=jax.ShapeDtypeStruct((num_blocks, 8, 128), jnp.float32),
        grid_spec=pltpu.PrefetchScalarGridSpec(
            num_scalar_prefetch=0,
            grid=(num_blocks,),
            in_specs=[
                pl.BlockSpec((row_tile, C), lambda i: (i, 0)),
                pl.BlockSpec((row_tile, 1), lambda i: (i, 0)),
            ],
            out_specs=pl.BlockSpec((1, 8, 128), lambda i: (i, 0, 0)),
        ),
        compiler_params=pltpu.CompilerParams(
            dimension_semantics=("parallel",),
            vmem_limit_bytes=vmem_limit),
    )(pred, tgt2d)

    # Final reduction / mean in XLA (per-block partial sums live at [:, 0, 0]).
    return jnp.sum(partials[:, 0, 0]) / jnp.float32(N)


def _reference(pred, target, *, smoothing=SMOOTHING, ignore_index=IGNORE_INDEX):
    N, C = pred.shape
    logp = jax.nn.log_softmax(pred.astype(jnp.float32), axis=1)
    valid = target != ignore_index
    tgt = jnp.where(valid, target, 0)
    true_dist = jnp.full((N, C), smoothing / (C - 1), jnp.float32)
    true_dist = true_dist.at[jnp.arange(N), tgt].set(1.0 - smoothing)
    true_dist = jnp.where(valid[:, None], true_dist, 0.0)
    return jnp.mean(jnp.sum(-true_dist * logp, axis=1))


if __name__ == "__main__":
    key = jax.random.PRNGKey(0)
    k1, k2, k3, k4 = jax.random.split(key, 4)

    # Primary small test (f32), consistent with the module's forward.
    N, C = 16, 32
    pred = jax.random.normal(k1, (N, C), jnp.float32)
    target = jax.random.randint(k2, (N,), 0, C, jnp.int32)  # some rows hit ignore_index=1
    loss = jax.block_until_ready(label_smoothing_loss(pred, target))
    ref = _reference(pred, target)
    assert jnp.allclose(loss, ref, atol=1e-5, rtol=1e-5), (loss, ref)

    # bf16 input + N not a multiple of the (16-aligned) tile -> exercises padding.
    N2, C2 = 20, 40
    pred2 = jax.random.normal(k3, (N2, C2), jnp.bfloat16)
    target2 = jax.random.randint(k4, (N2,), 0, C2, jnp.int32)
    loss2 = jax.block_until_ready(label_smoothing_loss(pred2, target2))
    ref2 = _reference(pred2.astype(jnp.float32), target2)
    assert jnp.allclose(loss2, ref2, atol=1e-4, rtol=1e-4), (loss2, ref2)

    # Multi-block grid (forced small tile) -> exercises the parallel per-block
    # partial-sum outputs and the host-side reduction.
    N3, C3 = 200, 256
    pred3 = jax.random.normal(jax.random.PRNGKey(7), (N3, C3), jnp.float32)
    target3 = jax.random.randint(jax.random.PRNGKey(8), (N3,), 0, C3, jnp.int32)
    loss3 = jax.block_until_ready(label_smoothing_loss(pred3, target3, row_tile=64))
    ref3 = _reference(pred3, target3)
    assert jnp.allclose(loss3, ref3, atol=1e-5, rtol=1e-5), (loss3, ref3)

    print("KERNEL_OK")
</pallas_src>

<mosaic_0001>
module attributes {stable_mosaic.version = 11 : i64} {
  func.func @_label_smoothing_kernel(%arg0: i32, %arg1: memref<16x32xf32, #tpu.memory_space<vmem>>, %arg2: memref<16x1xi32, #tpu.memory_space<vmem>>, %arg3: memref<1x8x128xf32, #tpu.memory_space<vmem>>) attributes {dimension_semantics = [#tpu.dimension_semantics<parallel>], iteration_bounds = array<i64: 1>, scalar_prefetch = 0 : i64, scratch_operands = 0 : i64, tpu.core_type = #tpu.core_type<tc>, window_params = [{transform_indices = @transform_0, window_bounds = array<i64: 16, 32>}, {transform_indices = @transform_1, window_bounds = array<i64: 16, 1>}, {transform_indices = @transform_2, window_bounds = array<i64: 1, 8, 128>}]} {
    %c0 = arith.constant 0 : index
    %c0_0 = arith.constant 0 : index
    %0 = vector.load %arg1[%c0, %c0_0] : memref<16x32xf32, #tpu.memory_space<vmem>>, vector<16x32xf32>
    %c0_1 = arith.constant 0 : index
    %c0_2 = arith.constant 0 : index
    %1 = vector.load %arg2[%c0_1, %c0_2] : memref<16x1xi32, #tpu.memory_space<vmem>>, vector<16x1xi32>
    %cst = arith.constant dense<0xFF800000> : vector<16xf32>
    %2 = vector.multi_reduction <maximumf>, %0, %cst [1] : vector<16x32xf32> to vector<16xf32>
    %3 = vector.shape_cast %2 : vector<16xf32> to vector<16x1xf32>
    %4 = vector.broadcast %3 : vector<16x1xf32> to vector<16x32xf32>
    %5 = arith.subf %0, %4 : vector<16x32xf32>
    %6 = math.exp %5 : vector<16x32xf32>
    %cst_3 = arith.constant dense<0.000000e+00> : vector<16xf32>
    %7 = vector.multi_reduction <add>, %6, %cst_3 [1] : vector<16x32xf32> to vector<16xf32>
    %8 = vector.shape_cast %7 : vector<16xf32> to vector<16x1xf32>
    %9 = math.log %8 : vector<16x1xf32>
    %c1_i32 = arith.constant 1 : i32
    %10 = vector.broadcast %c1_i32 : i32 to vector<16x1xi32>
    %11 = arith.cmpi ne, %1, %10 : vector<16x1xi32>
    %c0_i32 = arith.constant 0 : i32
    %12 = vector.broadcast %c0_i32 : i32 to vector<16x1xi32>
    %13 = arith.select %11, %1, %12 : vector<16x1xi1>, vector<16x1xi32>
    %14 = tpu.iota {dimensions = array<i32: 1>} : vector<16x32xi32>
    %15 = vector.broadcast %13 : vector<16x1xi32> to vector<16x32xi32>
    %16 = arith.cmpi eq, %14, %15 : vector<16x32xi32>
    %cst_4 = arith.constant 0.899999976 : f32
    %cst_5 = arith.constant 0.0032258064 : f32
    %17 = vector.broadcast %cst_4 : f32 to vector<16x32xf32>
    %18 = vector.broadcast %cst_5 : f32 to vector<16x32xf32>
    %19 = arith.select %16, %17, %18 : vector<16x32xi1>, vector<16x32xf32>
    %20 = arith.mulf %19, %5 : vector<16x32xf32>
    %cst_6 = arith.constant dense<0.000000e+00> : vector<16xf32>
    %21 = vector.multi_reduction <add>, %20, %cst_6 [1] : vector<16x32xf32> to vector<16xf32>
    %22 = vector.shape_cast %21 : vector<16xf32> to vector<16x1xf32>
    %23 = arith.subf %9, %22 : vector<16x1xf32>
    %cst_7 = arith.constant 0.000000e+00 : f32
    %24 = vector.broadcast %cst_7 : f32 to vector<16x1xf32>
    %25 = arith.select %11, %23, %24 : vector<16x1xi1>, vector<16x1xf32>
    %26 = vector.shape_cast %25 : vector<16x1xf32> to vector<1x16x1xf32>
    %cst_8 = arith.constant dense<0.000000e+00> : vector<1xf32>
    %27 = vector.multi_reduction <add>, %26, %cst_8 [1, 2] : vector<1x16x1xf32> to vector<1xf32>
    %28 = vector.shape_cast %27 : vector<1xf32> to vector<1x1x1xf32>
    %29 = vector.extract %28[0, 0, 0] : f32 from vector<1x1x1xf32>
    %cst_9 = arith.constant 0.000000e+00 : f32
    %30 = vector.broadcast %cst_9 : f32 to vector<1x8x128xf32>
    %31 = vector.broadcast %29 : f32 to vector<1x8x128xf32>
    %32 = arith.addf %30, %31 : vector<1x8x128xf32>
    %c0_10 = arith.constant 0 : index
    %c0_11 = arith.constant 0 : index
    %c0_12 = arith.constant 0 : index
    %33 = vector.load %arg3[%c0_10, %c0_11, %c0_12] : memref<1x8x128xf32, #tpu.memory_space<vmem>>, vector<1x8x128xf32>
    tpu.vector_store %arg3[%c0_10, %c0_11, %c0_12], %32 {strides = array<i32>} : memref<1x8x128xf32, #tpu.memory_space<vmem>>, vector<1x8x128xf32>,
    return
  }
  func.func @transform_0(%arg0: i32) -> (i32, i32) {
    %c0_i32 = arith.constant 0 : i32
    %c0_i32_0 = arith.constant 0 : i32
    return %arg0, %c0_i32 : i32, i32
  }
  func.func @transform_1(%arg0: i32) -> (i32, i32) {
    %c0_i32 = arith.constant 0 : i32
    %c0_i32_0 = arith.constant 0 : i32
    return %arg0, %c0_i32 : i32, i32
  }
  func.func @transform_2(%arg0: i32) -> (i32, i32, i32) {
    %c0_i32 = arith.constant 0 : i32
    %c0_i32_0 = arith.constant 0 : i32
    %c0_i32_1 = arith.constant 0 : i32
    return %arg0, %c0_i32, %c0_i32_0 : i32, i32, i32
  }
}

</mosaic_0001>

<bundles_post_ra>
// kernel: tpu_custom_call.1
= control target key start
LH: loop header
LB: loop body
LE: loop exit
PB: predicated region body
PF: predicated region fallthrough
CT: control target
= control target key end

     0   :  { %vm16_vm0 = vcmask 261120   ;;  %v136_v4 = vmov 0   ;;  %s188_s0 = inlined_call_operand.vmem [shape: f32[16,32], index: 0, kind: input, shape index: {}]   ;;  %s189_s1 = inlined_call_operand.vmem [shape: s32[16,1], index: 1, kind: input, shape index: {}]   ;;  %s190_s2 = inlined_call_operand.hbm [shape: f32[1,8,128], index: 2, kind: output, shape index: {}]  }
   0x1   :  { %v12_v0 = vld [vmem:[%s188_s0] sm:$0xff]  ;;  %v13_v1 = vld [vmem:[%s188_s0 + $0x8] sm:$0xff]  ;;  %102 = vset.pattern.permute.xlu1 %v136_v4  ;;  %103 = vset.pattern.permute.xlu0 %v136_v4 }
   0x2   :  { %v14_v2 = vld [vmem:[%s189_s1] sm:$0xff]  ;;  %v17_v3 = vsel %vm16_vm0, %v12_v0, -inf  ;;  %v15_v5 = vld [vmem:[%s189_s1 + $0x8] sm:$0xff] }
   0x3   :  { %vm39_vm1 = vcmp.ne.s32.totalorder %v14_v2, 1  ;;  %18 = vmax.xlane.f32.xlu0 %v17_v3  ;;  %vm40_vm2 = vcmp.ne.s32.totalorder %v15_v5, 1 }
   0x4   :  { %v41_v6 = vsel %vm39_vm1, %v14_v2, 0 }
   0x5   :  { %7 = vsyncpa [#allocation3], 0  ;;  %v20_v7 = vsel %vm16_vm0, %v13_v1, -inf  ;;  %46 = vperm.xlu1 %102, %v41_v6   ;;  %v42_v8 = vsel %vm40_vm2, %v15_v5, 0  ;;  %v43_v11 = vlaneseq  ;;  %v137_v19 = vmov 0.0032258064  }
   0x6   :  { %vm67_vm5 = vcmask 7168   ;;  %s138_s0 = smov [#allocation2]  }
   0x7   :  { %21 = vmax.xlane.f32.xlu0 %v20_v7  ;;  %v44_v16 = vand.u32 127, %v43_v11  ;;  %s89_s1 = sshll.u32 %s138_s0, 4  ;;  %s90_s1 = int_to_ptr.vmem [resolvable:$true] %s89_s1 }
   0x8   :  { %s112_s18 = scalar_lea.vmem %s90_s1, 128  ;;  %p117_p1 = scmp.lt.s32.totalorder %s90_s1, %s90_s1 }
   0x9   :  { %49 = vperm.xlu1 %102, %v42_v8   ;;  %p113_p0 = scmp.ne.s32.totalorder %s90_s1, %s112_s18  ;;  %p118_p2 = scmp.lt.s32.totalorder %s112_s18, %s112_s18 }
   0xb   :  { %p119_p3 = por %p118_p2, %p117_p1 }
   0xd   :  { %p120_p4 = pnand %p119_p3, %p113_p0 }
  0x84   :  { %v47_v14 = vpop.permute.xlu1 %46 }
  0x85   :  { %vm51_vm3 = vcmp.eq.s32.totalorder %v44_v16, %v47_v14 }
  0x86   :  { %v53_v20 = vsel %vm51_vm3, 0.9, %v137_v19 }
  0x88   :  { %v50_v18 = vpop.permute.xlu1 %49 }
  0x89   :  { %vm52_vm4 = vcmp.eq.s32.totalorder %v44_v16, %v50_v18 }
  0x8a   :  { %v54_v24 = vsel %vm52_vm4, 0.9, %v137_v19 }
  0x90   :  { %v19_v9 = vpop.xlane.xlu0 %18 }
  0x91   :  { %v23_v10 = vsub.f32 %v12_v0, %v19_v9 }
  0x93   :  { %v25_v12 = vmul.f32 1.442695, %v23_v10  ;;  %v55_v23 = vmul.f32 %v53_v20, %v23_v10 }
  0x94   :  { %v22_v13 = vpop.xlane.xlu0 %21 }
  0x95   :  { %104 = vpow2.f32 %v25_v12  ;;  %v24_v15 = vsub.f32 %v13_v1, %v22_v13  ;;  %v57_v26 = vsel %vm16_vm0, %v55_v23, 0.0 }
  0x97   :  { %v27_v17 = vmul.f32 1.442695, %v24_v15  ;;  %v56_v28 = vmul.f32 %v54_v24, %v24_v15 }
  0x99   :  { %106 = vpow2.f32 %v27_v17  ;;  %v60_v29 = vsel %vm16_vm0, %v56_v28, 0.0 }
  0x9f   :  { %v105_v21 = vpop.eup %104 }
  0xa0   :  { %v29_v22 = vsel %vm16_vm0, %v105_v21, 0.0 }
  0xa1   :  { %30 = vadd.xlane.f32.xlu0 %v29_v22 }
  0xa3   :  { %v107_v25 = vpop.eup %106 }
  0xa4   :  { %v32_v27 = vsel %vm16_vm0, %v107_v25, 0.0 }
  0xa5   :  { %58 = vadd.xlane.f32.xlu0 %v57_v26  ;;  %33 = vadd.xlane.f32.xlu1 %v32_v27 }
  0xa9   :  { %61 = vadd.xlane.f32.xlu0 %v60_v29 }
 0x12e   :  { %v31_v30 = vpop.xlane.xlu0 %30 }
 0x12f   :  { %108 = vlog2.f32 %v31_v30 }
 0x132   :  { %v34_v31 = vpop.xlane.xlu1 %33  ;;  %v59_v33 = vpop.xlane.xlu0 %58 }
 0x133   :  { %110 = vlog2.f32 %v34_v31 }
 0x136   :  { %v62_v38 = vpop.xlane.xlu0 %61 }
 0x139   :  { %v109_v32 = vpop.eup %108 }
 0x13a   :  { %v36_v34 = vmul.f32 0.6931472, %v109_v32 }
 0x13c   :  { %v63_v35 = vsub.f32 %v36_v34, %v59_v33 }
 0x13d   :  { %v111_v36 = vpop.eup %110 }
 0x13e   :  { %v38_v37 = vmul.f32 0.6931472, %v111_v36  ;;  %v65_v39 = vsel %vm39_vm1, %v63_v35, 0.0 }
 0x13f   :  { %v68_v42 = vsel %vm67_vm5, %v65_v39, 0.0 }
 0x140   :  { %v64_v40 = vsub.f32 %v38_v37, %v62_v38 }
 0x142   :  { %v66_v41 = vsel %vm40_vm2, %v64_v40, 0.0 }
 0x143   :  { %v69_v43 = vsel %vm67_vm5, %v66_v41, 0.0 }
 0x144   :  { %v70_v44 = vadd.f32 %v69_v43, %v68_v42 }
 0x146   :  { %71 = vadd.xlane.f32.xlu0 %v70_v44 }
 0x1d3   :  { %v72_v45 = vpop.xlane.xlu0 %71 }
 0x1d4   :  { %v73_v46 = vrot.slane %v72_v45, 4 }
 0x1d6   :  { %v74_v47 = vadd.f32 %v73_v46, %v72_v45 }
 0x1d8   :  { %v75_v48 = vrot.slane %v74_v47, 2 }
 0x1da   :  { %v76_v49 = vadd.f32 %v75_v48, %v74_v47 }
 0x1dc   :  { %v77_v50 = vrot.slane %v76_v49, 1 }
 0x1de   :  { %v78_v51 = vadd.f32 %v77_v50, %v76_v49 }
 0x1e0   :  { %97 = vpush %v78_v51 }
 0x211   :  { %s98_s17 = spop %97 }
 0x212   :  { %v80_v52 = vstv %s98_s17 }
 0x213   :  { %82 = vst [vmem:[#allocation2] sm:$0xff] %v80_v52 }
 0x214   :  { %123 = shalt.err (!%p120_p4)
}
 0x215   :  { %s124_s21 = scalar_lea.hbm %s190_s2, 128 }
 0x216   :  { %p125_p5 = scmp.ne.s32.totalorder %s190_s2, %s124_s21  ;;  %p128_p6 = scmp.lt.u32.totalorder %s124_s21, %s190_s2 }
 0x218   :  { %p130_p7 = pnand %p128_p6, %p125_p5 }
 0x21a   :  { %133 = shalt.err (!%p130_p7)
}
 0x21b   :  { %92 = dma.vmem_to_hbm [thread:$0]  %s90_s1, 128, %s190_s2, [#allocation3]  }
 0x21c   :  { %134 = dma.done.wait [#allocation3], 128  }
 0x21d   :  { %135 = vsyncadd [#allocation3], 4294967168 }
 0x21e   :  { %96 = vsyncpa [#allocation3], 1 }

</bundles_post_ra>
